<compile_context>
chip_gen: v7x
topology: tpu7x:2x2x1
jax: 0.10.0
libtpu: 0.0.40
codegen_flags: <defaults>
</compile_context>

<pallas_src>
import functools

import jax
import jax.numpy as jnp
from jax.experimental import pallas as pl
from jax.experimental.pallas import tpu as pltpu

LANES = 128                            # TPU lane width (fast axis of a vreg)
BLOCK_BYTES_DEFAULT = 4 * 1024 * 1024  # 4 MiB per input per pipeline buffer
VMEM_LIMIT_BYTES = 64 * 1024 * 1024    # explicit scoped-VMEM limit


def _sq_diff_sum_kernel(p_ref, t_ref, o_ref, acc_ref, *,
                        block_rows, acc_rows, main_rows):
    """Accumulate sum((p - t)^2) for one core's share of the row-blocks.

    acc_ref is an (acc_rows, 128) f32 VMEM accumulator: the steady-state loop
    is loads + VPU subtract/multiply/add only; the cross-lane/sublane reduce
    happens once per core in the epilogue. The ragged last block (and any
    clamped duplicate block on the second core) is masked by global row id.
    """
    c = pl.program_id(0)                 # core-split index (v7x megacore)
    i = pl.program_id(1)                 # streaming block index within split
    n_inner = pl.num_programs(1)

    @pl.when(i == 0)
    def _():
        acc_ref[...] = jnp.zeros_like(acc_ref)

    blk = c * n_inner + i                # un-clamped global block id
    row_start = blk * block_rows

    d = p_ref[...].astype(jnp.float32) - t_ref[...].astype(jnp.float32)
    sq = d * d

    def _accumulate(vals):
        # (block_rows, 128) -> (block_rows/acc_rows, acc_rows, 128): summing
        # the leading axis is vreg-wise VPU adds (no XLU in the hot loop) and
        # keeps the dependent-add chain short.
        acc_ref[...] += jnp.sum(
            vals.reshape(block_rows // acc_rows, acc_rows, LANES), axis=0)

    is_full = row_start + block_rows <= main_rows

    @pl.when(is_full)            # hot path: no masking work at all
    def _():
        _accumulate(sq)

    @pl.when(jnp.logical_not(is_full))   # ragged / clamped-duplicate block
    def _():
        row_ids = jax.lax.broadcasted_iota(jnp.int32, (block_rows, LANES), 0)
        valid = (row_ids + row_start) < main_rows
        _accumulate(jnp.where(valid, sq, jnp.float32(0.0)))

    @pl.when(i == n_inner - 1)
    def _():
        o_ref[0, 0] = jnp.sum(acc_ref[...])


@functools.partial(jax.jit, static_argnames=("block_bytes",))
def mse_loss_pallas(prediction, target, block_bytes=BLOCK_BYTES_DEFAULT):
    """MSE loss (mean over all elements), hot path in a Pallas TPU kernel."""
    assert prediction.shape == target.shape, (
        "shapes must match (no broadcasting in mse_loss hot path)")
    total_n = int(prediction.size)

    p = prediction.reshape(-1)
    t = target.reshape(-1)

    itemsize = jnp.dtype(prediction.dtype).itemsize
    # Minimum sublane multiple for the packed layout of this dtype:
    # f32 -> 8, bf16 -> 16, int8/fp8 -> 32.
    sub = max(8, 32 // max(1, itemsize))

    rows_all = total_n // LANES
    main_rows = (rows_all // sub) * sub        # kernel-consumed rows
    main_elems = main_rows * LANES

    total_sum = jnp.float32(0.0)

    if main_rows > 0:
        # Constant-byte blocks: rows scale with 4/itemsize for narrow dtypes.
        target_rows = max(sub, (block_bytes // (LANES * itemsize)) // sub * sub)
        block_rows = min(target_rows, main_rows)
        acc_rows = 32 if block_rows % 32 == 0 else (
            16 if block_rows % 16 == 0 else 8)

        n_blocks = (main_rows + block_rows - 1) // block_rows
        # 2-way core split (used by v7x megacore; a harmless serial outer loop
        # on single-TC v5e/v6e). Skip it when there is only one block so we
        # never stream a fully-masked duplicate block.
        n_split = 2 if n_blocks >= 2 else 1
        n_inner = (n_blocks + n_split - 1) // n_split

        if main_elems == total_n:
            # Common case: pure bitcast view, nothing materialized.
            p2 = p.reshape(main_rows, LANES)
            t2 = t.reshape(main_rows, LANES)
        else:
            p2 = p[:main_elems].reshape(main_rows, LANES)
            t2 = t[:main_elems].reshape(main_rows, LANES)

        def in_map(c, i):
            # Clamp so an odd block count never indexes past the array; the
            # kernel masks the clamped duplicate to zero via its true row ids.
            return (jnp.minimum(c * n_inner + i, n_blocks - 1), 0)

        kernel = functools.partial(
            _sq_diff_sum_kernel,
            block_rows=block_rows, acc_rows=acc_rows, main_rows=main_rows)

        partials = pl.pallas_call(
            kernel,
            out_shape=jax.ShapeDtypeStruct((n_split, 1), jnp.float32),
            grid_spec=pltpu.PrefetchScalarGridSpec(
                num_scalar_prefetch=0,
                grid=(n_split, n_inner),
                in_specs=[
                    pl.BlockSpec((block_rows, LANES), in_map),
                    pl.BlockSpec((block_rows, LANES), in_map),
                ],
                out_specs=pl.BlockSpec(
                    (1, 1), lambda c, i: (c, 0), memory_space=pltpu.SMEM),
                scratch_shapes=[pltpu.VMEM((acc_rows, LANES), jnp.float32)],
            ),
            compiler_params=pltpu.CompilerParams(
                dimension_semantics=("parallel", "arbitrary"),
                vmem_limit_bytes=VMEM_LIMIT_BYTES,
            ),
            cost_estimate=pl.CostEstimate(
                flops=3 * main_elems,
                transcendentals=0,
                bytes_accessed=2 * main_elems * itemsize + 4 * n_split,
            ),
        )(p2, t2)
        total_sum = total_sum + jnp.sum(partials)

    # Tail (< sub rows + <128 lane remainder): tiny plain-JAX reduction.
    tail_n = total_n - main_elems
    if tail_n > 0:
        pt = p[main_elems:].astype(jnp.float32)
        tt = t[main_elems:].astype(jnp.float32)
        dt = pt - tt
        total_sum = total_sum + jnp.sum(dt * dt)

    # total_n == 0 gives NaN, matching torch's F.mse_loss on empty inputs.
    return total_sum / jnp.float32(total_n)


class CompoundLossDcstfnPallas:
    """JAX/Pallas equivalent of CompoundLossDcstfn.

    `pretrained`, `alpha`, `normalize` are stored for API parity but (as in
    the PyTorch forward) are unused: forward returns F.mse_loss(pred, target).
    """

    def __init__(self, pretrained=None, alpha=0.8, normalize=True):
        self.pretrained = pretrained
        self.alpha = alpha
        self.normalize = normalize

    def __call__(self, prediction, target):
        return mse_loss_pallas(prediction, target)


if __name__ == "__main__":
    key = jax.random.PRNGKey(0)
    k1, k2, k3, k4, k5, k6 = jax.random.split(key, 6)

    loss_fn = CompoundLossDcstfnPallas(pretrained=None, alpha=0.8, normalize=True)

    # 1) Spec-consistent small NCHW input (single full block, zero-copy view).
    p1 = jax.random.normal(k1, (2, 4, 16, 16), dtype=jnp.float32)
    t1 = jax.random.normal(k2, (2, 4, 16, 16), dtype=jnp.float32)
    out1 = jax.block_until_ready(loss_fn(p1, t1))
    ref1 = jnp.mean((p1 - t1) ** 2)
    assert jnp.allclose(out1, ref1, rtol=1e-6, atol=1e-6), (out1, ref1)

    # 2) Tiny block override: exercises the 2-way core split and the in-kernel
    #    ragged-row masking of the last block.
    p2 = jax.random.normal(k3, (3, 4, 16, 16), dtype=jnp.float32)
    t2 = jax.random.normal(k4, (3, 4, 16, 16), dtype=jnp.float32)
    out2 = jax.block_until_ready(mse_loss_pallas(p2, t2, block_bytes=8192))
    ref2 = jnp.mean((p2 - t2) ** 2)
    assert jnp.allclose(out2, ref2, rtol=1e-6, atol=1e-6), (out2, ref2)

    # 3) Ragged total size: row/lane tail handled in plain JAX next to kernel.
    p3 = jax.random.normal(k5, (2, 3, 17, 19), dtype=jnp.float32)
    t3 = jax.random.normal(k6, (2, 3, 17, 19), dtype=jnp.float32)
    out3 = jax.block_until_ready(loss_fn(p3, t3))
    ref3 = jnp.mean((p3 - t3) ** 2)
    assert jnp.allclose(out3, ref3, rtol=1e-6, atol=1e-6), (out3, ref3)

    print("KERNEL_OK")
</pallas_src>

<mosaic_0001>
module attributes {stable_mosaic.version = 11 : i64} {
  func.func @_sq_diff_sum_kernel(%arg0: i32, %arg1: i32, %arg2: memref<16x128xf32, #tpu.memory_space<vmem>>, %arg3: memref<16x128xf32, #tpu.memory_space<vmem>>, %arg4: memref<1x1xf32, #tpu.memory_space<smem>>, %arg5: memref<16x128xf32, #tpu.memory_space<vmem>>) attributes {dimension_semantics = [#tpu.dimension_semantics<parallel>, #tpu.dimension_semantics<arbitrary>], iteration_bounds = array<i64: 1, 1>, scalar_prefetch = 0 : i64, scratch_operands = 1 : i64, tpu.core_type = #tpu.core_type<tc>, window_params = [{transform_indices = @transform_0, window_bounds = array<i64: 16, 128>}, {transform_indices = @transform_1, window_bounds = array<i64: 16, 128>}, {transform_indices = @transform_2, window_bounds = array<i64: 1, 1>}]} {
    %c0_i32 = arith.constant 0 : i32
    %0 = arith.cmpi eq, %arg1, %c0_i32 : i32
    %1 = arith.extui %0 : i1 to i32
    %c0_i32_0 = arith.constant 0 : i32
    %2 = arith.cmpi ne, %1, %c0_i32_0 : i32
    scf.if %2 {
      %cst = arith.constant 0.000000e+00 : f32
      %20 = vector.broadcast %cst : f32 to vector<16x128xf32>
      %c0_10 = arith.constant 0 : index
      %c0_11 = arith.constant 0 : index
      %21 = vector.load %arg5[%c0_10, %c0_11] : memref<16x128xf32, #tpu.memory_space<vmem>>, vector<16x128xf32>
      tpu.vector_store %arg5[%c0_10, %c0_11], %20 {strides = array<i32>} : memref<16x128xf32, #tpu.memory_space<vmem>>, vector<16x128xf32>,
    } else {
    }
    %c1_i32 = arith.constant 1 : i32
    %3 = arith.muli %arg0, %c1_i32 : i32
    %4 = arith.addi %3, %arg1 : i32
    %c16_i32 = arith.constant 16 : i32
    %5 = arith.muli %4, %c16_i32 : i32
    %c0 = arith.constant 0 : index
    %c0_1 = arith.constant 0 : index
    %6 = vector.load %arg2[%c0, %c0_1] : memref<16x128xf32, #tpu.memory_space<vmem>>, vector<16x128xf32>
    %c0_2 = arith.constant 0 : index
    %c0_3 = arith.constant 0 : index
    %7 = vector.load %arg3[%c0_2, %c0_3] : memref<16x128xf32, #tpu.memory_space<vmem>>, vector<16x128xf32>
    %8 = arith.subf %6, %7 : vector<16x128xf32>
    %9 = arith.mulf %8, %8 : vector<16x128xf32>
    %c16_i32_4 = arith.constant 16 : i32
    %10 = arith.addi %5, %c16_i32_4 : i32
    %c16_i32_5 = arith.constant 16 : i32
    %11 = arith.cmpi sle, %10, %c16_i32_5 : i32
    %12 = arith.extui %11 : i1 to i32
    %c0_i32_6 = arith.constant 0 : i32
    %13 = arith.cmpi ne, %12, %c0_i32_6 : i32
    scf.if %13 {
      %c0_10 = arith.constant 0 : index
      %c0_11 = arith.constant 0 : index
      %20 = vector.load %arg5[%c0_10, %c0_11] : memref<16x128xf32, #tpu.memory_space<vmem>>, vector<16x128xf32>
      %21 = vector.shape_cast %9 : vector<16x128xf32> to vector<1x16x128xf32>
      %cst = arith.constant dense<0.000000e+00> : vector<16x128xf32>
      %22 = vector.multi_reduction <add>, %21, %cst [0] : vector<1x16x128xf32> to vector<16x128xf32>
      %23 = arith.addf %20, %22 : vector<16x128xf32>
      %c0_12 = arith.constant 0 : index
      %c0_13 = arith.constant 0 : index
      %24 = vector.load %arg5[%c0_12, %c0_13] : memref<16x128xf32, #tpu.memory_space<vmem>>, vector<16x128xf32>
      tpu.vector_store %arg5[%c0_12, %c0_13], %23 {strides = array<i32>} : memref<16x128xf32, #tpu.memory_space<vmem>>, vector<16x128xf32>,
    } else {
    }
    %true = arith.constant true
    %14 = arith.xori %11, %true : i1
    %15 = arith.extui %14 : i1 to i32
    %c0_i32_7 = arith.constant 0 : i32
    %16 = arith.cmpi ne, %15, %c0_i32_7 : i32
    scf.if %16 {
      %20 = tpu.iota {dimensions = array<i32: 0>} : vector<16x128xi32>
      %21 = vector.broadcast %5 : i32 to vector<16x128xi32>
      %22 = arith.addi %20, %21 : vector<16x128xi32>
      %c16_i32_10 = arith.constant 16 : i32
      %23 = vector.broadcast %c16_i32_10 : i32 to vector<16x128xi32>
      %24 = arith.cmpi slt, %22, %23 : vector<16x128xi32>
      %cst = arith.constant 0.000000e+00 : f32
      %25 = vector.broadcast %cst : f32 to vector<16x128xf32>
      %26 = arith.select %24, %9, %25 : vector<16x128xi1>, vector<16x128xf32>
      %c0_11 = arith.constant 0 : index
      %c0_12 = arith.constant 0 : index
      %27 = vector.load %arg5[%c0_11, %c0_12] : memref<16x128xf32, #tpu.memory_space<vmem>>, vector<16x128xf32>
      %28 = vector.shape_cast %26 : vector<16x128xf32> to vector<1x16x128xf32>
      %cst_13 = arith.constant dense<0.000000e+00> : vector<16x128xf32>
      %29 = vector.multi_reduction <add>, %28, %cst_13 [0] : vector<1x16x128xf32> to vector<16x128xf32>
      %30 = arith.addf %27, %29 : vector<16x128xf32>
      %c0_14 = arith.constant 0 : index
      %c0_15 = arith.constant 0 : index
      %31 = vector.load %arg5[%c0_14, %c0_15] : memref<16x128xf32, #tpu.memory_space<vmem>>, vector<16x128xf32>
      tpu.vector_store %arg5[%c0_14, %c0_15], %30 {strides = array<i32>} : memref<16x128xf32, #tpu.memory_space<vmem>>, vector<16x128xf32>,
    } else {
    }
    %c0_i32_8 = arith.constant 0 : i32
    %17 = arith.cmpi eq, %arg1, %c0_i32_8 : i32
    %18 = arith.extui %17 : i1 to i32
    %c0_i32_9 = arith.constant 0 : i32
    %19 = arith.cmpi ne, %18, %c0_i32_9 : i32
    scf.if %19 {
      %c0_10 = arith.constant 0 : index
      %c0_11 = arith.constant 0 : index
      %20 = vector.load %arg5[%c0_10, %c0_11] : memref<16x128xf32, #tpu.memory_space<vmem>>, vector<16x128xf32>
      %21 = vector.shape_cast %20 : vector<16x128xf32> to vector<1x16x128xf32>
      %cst = arith.constant dense<0.000000e+00> : vector<1xf32>
      %22 = vector.multi_reduction <add>, %21, %cst [1, 2] : vector<1x16x128xf32> to vector<1xf32>
      %23 = vector.shape_cast %22 : vector<1xf32> to vector<1x1x1xf32>
      %24 = vector.extract %23[0, 0, 0] : f32 from vector<1x1x1xf32>
      %c0_12 = arith.constant 0 : index
      %c0_13 = arith.constant 0 : index
      %25 = memref.load %arg4[%c0_12, %c0_13] : memref<1x1xf32, #tpu.memory_space<smem>>
      memref.store %24, %arg4[%c0_12, %c0_13] : memref<1x1xf32, #tpu.memory_space<smem>>
    } else {
    }
    return
  }
  func.func @transform_0(%arg0: i32, %arg1: i32) -> (i32, i32) {
    %c1_i32 = arith.constant 1 : i32
    %0 = arith.muli %arg0, %c1_i32 : i32
    %1 = arith.addi %0, %arg1 : i32
    %c0_i32 = arith.constant 0 : i32
    %2 = arith.minsi %1, %c0_i32 : i32
    %c0_i32_0 = arith.constant 0 : i32
    %c0_i32_1 = arith.constant 0 : i32
    return %2, %c0_i32_0 : i32, i32
  }
  func.func @transform_1(%arg0: i32, %arg1: i32) -> (i32, i32) {
    %c1_i32 = arith.constant 1 : i32
    %0 = arith.muli %arg0, %c1_i32 : i32
    %1 = arith.addi %0, %arg1 : i32
    %c0_i32 = arith.constant 0 : i32
    %2 = arith.minsi %1, %c0_i32 : i32
    %c0_i32_0 = arith.constant 0 : i32
    %c0_i32_1 = arith.constant 0 : i32
    return %2, %c0_i32_0 : i32, i32
  }
  func.func @transform_2(%arg0: i32, %arg1: i32) -> (i32, i32) {
    %c0_i32 = arith.constant 0 : i32
    %c0_i32_0 = arith.constant 0 : i32
    return %arg0, %c0_i32 : i32, i32
  }
}

</mosaic_0001>

<bundles_post_ra>
// kernel: mse_loss_pallas.1
= control target key start
LH: loop header
LB: loop body
LE: loop exit
PB: predicated region body
PF: predicated region fallthrough
CT: control target
= control target key end

     0   :  { %7 = vsyncpa [#allocation4], 0  ;;  %s270_s0 = inlined_call_operand.hbm [shape: f32[16,128], index: 0, kind: input, shape index: {}]   ;;  %s271_s1 = inlined_call_operand.hbm [shape: f32[16,128], index: 1, kind: input, shape index: {}]   ;;  %s272_s2 = inlined_call_operand.hbm [shape: f32[1,1], index: 2, kind: output, shape index: {}]  }
   0x1   :  { %8 = vsyncpa [#allocation7], 0 }
   0x2   :  { %9 = vsyncpa [#allocation5], 0  ;;  %s214_s9 = smov [#allocation3]   ;;  %s154_s13 = scalar_lea.hbm %s270_s0, 256 }
   0x3   :  { %s21_s10 = sshll.u32 %s214_s9, 4  ;;  %p155_p0 = scmp.ne.s32.totalorder %s270_s0, %s154_s13  ;;  %s22_s10 = int_to_ptr.vmem [resolvable:$true] %s21_s10 }
   0x4   :  { %p158_p1 = scmp.lt.u32.totalorder %s154_s13, %s270_s0 }
   0x6   :  { %p160_p2 = pnand %p158_p1, %p155_p0 }
   0x8   :  { %163 = shalt.err (!%p160_p2)
}
   0x9   :  { %s164_s18 = scalar_lea.vmem %s22_s10, 256  ;;  %p169_p4 = scmp.lt.s32.totalorder %s22_s10, %s22_s10 }
   0xa   :  { %p165_p3 = scmp.ne.s32.totalorder %s22_s10, %s164_s18  ;;  %p170_p5 = scmp.lt.s32.totalorder %s164_s18, %s164_s18 }
   0xc   :  { %p171_p6 = por %p170_p5, %p169_p4 }
   0xe   :  { %p172_p7 = pnand %p171_p6, %p165_p3 }
  0x10   :  { %175 = shalt.err (!%p172_p7)
}
  0x11   :  { %s215_s19 = smov 128   ;;  %s216_s20 = smov 8  }
  0x12   :  { %27 = dma.hbm_to_vmem [thread:$0]  %s270_s0, 256, %s22_s10, [#allocation4], %s215_s19, %s215_s19, %s216_s20  }
  0x13   :  { %s217_s23 = smov [#allocation6]   ;;  %s176_s27 = scalar_lea.hbm %s271_s1, 256 }
  0x14   :  { %s39_s24 = sshll.u32 %s217_s23, 4  ;;  %p177_p8 = scmp.ne.s32.totalorder %s271_s1, %s176_s27  ;;  %s40_s24 = int_to_ptr.vmem [resolvable:$true] %s39_s24 }
  0x15   :  { %p180_p9 = scmp.lt.u32.totalorder %s176_s27, %s271_s1 }
  0x17   :  { %p182_p10 = pnand %p180_p9, %p177_p8 }
  0x19   :  { %185 = shalt.err (!%p182_p10)
}
  0x1a   :  { %s186_s4 = scalar_lea.vmem %s40_s24, 256  ;;  %p191_p12 = scmp.lt.s32.totalorder %s40_s24, %s40_s24 }
  0x1b   :  { %p187_p11 = scmp.ne.s32.totalorder %s40_s24, %s186_s4  ;;  %p192_p13 = scmp.lt.s32.totalorder %s186_s4, %s186_s4 }
  0x1d   :  { %p193_p0 = por %p192_p13, %p191_p12 }
  0x1f   :  { %p194_p1 = pnand %p193_p0, %p187_p11 }
  0x21   :  { %197 = shalt.err (!%p194_p1)
}
  0x22   :  { %45 = dma.hbm_to_vmem [thread:$0]  %s271_s1, 256, %s40_s24, [#allocation7], %s215_s19, %s215_s19, %s216_s20  }
  0x23   :  { %208 = dma.done.wait [#allocation4], 256  }
  0x24   :  { %209 = vsyncadd [#allocation4], 4294967040 }
  0x25   :  { %210 = dma.done.wait [#allocation7], 256  }
  0x26   :  { %211 = vsyncadd [#allocation7], 4294967040  ;;  %v68_v0 = vld [vmem:[#allocation3] sm:$0xff]  ;;  %v69_v1 = vld [vmem:[#allocation3 + $0x8] sm:$0xff]  ;;  %s198_s8 = scalar_lea.hbm %s272_s2, 16 }
  0x27   :  { %v70_v2 = vld [vmem:[#allocation6] sm:$0xff]  ;;  %v71_v3 = vld [vmem:[#allocation6 + $0x8] sm:$0xff]  ;;  %p199_p2 = scmp.ne.s32.totalorder %s272_s2, %s198_s8  ;;  %p202_p3 = scmp.lt.u32.totalorder %s198_s8, %s272_s2 }
  0x28   :  { %v72_v4 = vsub.f32 %v68_v0, %v70_v2  ;;  %v73_v5 = vsub.f32 %v69_v1, %v71_v3 }
  0x29   :  { %p204_p4 = pnand %p202_p3, %p199_p2 }
  0x2a   :  { %v74_v6 = vmul.f32 %v72_v4, %v72_v4  ;;  %v75_v7 = vmul.f32 %v73_v5, %v73_v5 }
  0x2c   :  { %v116_v8 = vadd.f32 %v75_v7, %v74_v6 }
  0x2e   :  { %117 = vadd.xlane.f32.xlu0 %v116_v8 }
  0xbb   :  { %v118_v9 = vpop.xlane.xlu0 %117 }
  0xbc   :  { %v119_v10 = vrot.slane %v118_v9, 4 }
  0xbe   :  { %v120_v11 = vadd.f32 %v119_v10, %v118_v9 }
  0xc0   :  { %v121_v12 = vrot.slane %v120_v11, 2 }
  0xc2   :  { %v122_v13 = vadd.f32 %v121_v12, %v120_v11 }
  0xc4   :  { %v123_v14 = vrot.slane %v122_v13, 1 }
  0xc6   :  { %v124_v15 = vadd.f32 %v123_v14, %v122_v13 }
  0xc8   :  { %147 = vpush %v124_v15 }
  0xf9   :  { %s148_s1 = spop %147 }
  0xfa   :  { %127 = sst [smem:[#allocation8]] %s148_s1 }
  0xfb   :  { %207 = shalt.err (!%p204_p4)
}
  0xfc   :  { %s218_s13 = smov [#allocation8]  }
  0xfd   :  { %135 = dma.smem_to_hbm %s218_s13, 16, %s272_s2, [#allocation5]  }
  0xfe   :  { %212 = dma.done.wait [#allocation5], 16  }
  0xff   :  { %213 = vsyncadd [#allocation5], 4294967280 }
 0x100   :  { %139 = sfence }
 0x101   :  { %140 = vsyncpa [#allocation4], 1 }
 0x102   :  { %141 = vsyncpa [#allocation7], 1 }
 0x103   :  { %142 = vsyncpa [#allocation5], 1 }

</bundles_post_ra>
